<compile_context>
chip_gen: v7x
topology: tpu7x:2x2x1
jax: 0.10.0
libtpu: 0.0.40
codegen_flags: <defaults>
</compile_context>

<pallas_src>
import jax
import jax.numpy as jnp
from jax.experimental import pallas as pl
from jax.experimental.pallas import tpu as pltpu

# Problem constants (small synthetic shapes consistent with the module).
N, H, W = 2, 16, 16          # batch, image height, width
K = 2                        # faces per pixel (rasterizer K); only k = 0 is consumed
C = 3                        # RGB channels
NUM_FACES = 64               # faces in the mesh

VROW = 8                     # sublane-aligned stride of per-vertex channel blocks
                             # in the color table (rows v*VROW + c)


def _shader_kernel(slab_ref, colors_ref, bg_ref, out_ref):
    """Single grid-less invocation over all P pixels, planar lane-dense layout.

    slab_ref   : (4, P)        f32  rows 0..2 = bary of top (k=0) face,
                                    row 3     = pix_to_face[..., 0] as f32 (-1 = bg)
    colors_ref : (3*VROW, F)   f32  row v*VROW + c = face_vertex_colors[f, v, c]
                                    (rows c >= 3 within each vertex block are zero)
    bg_ref     : (3, 1)        f32  background color
    out_ref    : (4, P)        f32  channel-planar RGBA
    """
    P = slab_ref.shape[1]
    F = colors_ref.shape[1]

    p2f = slab_ref[3:4, :]                                   # (1, P) f32
    p2f_i = p2f.astype(jnp.int32)                            # exact for small ints

    # Fused gather as a one-hot matmul on the MXU.  Background pixels (p2f < 0)
    # never match any face id 0..F-1, so their one-hot column is all zeros.
    face_ids = jax.lax.broadcasted_iota(jnp.int32, (F, P), 0)
    onehot = (face_ids == p2f_i).astype(jnp.float32)         # (F, P), exact 0/1 in f32

    # (3*VROW, F) @ (F, P) -> (3*VROW, P).  HIGHEST keeps the f32 colors bit-exact
    # (one-hot weights are exactly representable), matching the gather numerics.
    cols = jnp.dot(colors_ref[...], onehot,
                   preferred_element_type=jnp.float32,
                   precision=jax.lax.Precision.HIGHEST)

    # sample_textures (TexturesVertex): barycentric blend of the 3 vertex colors.
    # Each vertex's channel block starts at a sublane-tile boundary (v*VROW).
    texel = (slab_ref[0:1, :] * cols[0 * VROW:0 * VROW + 3, :]
             + slab_ref[1:2, :] * cols[1 * VROW:1 * VROW + 3, :]
             + slab_ref[2:3, :] * cols[2 * VROW:2 * VROW + 3, :])      # (3, P)

    # hard_rgb_blend: background color where no face; alpha = 1 everywhere.
    is_bg = p2f < 0.0                                                   # (1, P)
    out_ref[0:3, :] = jnp.where(is_bg, bg_ref[...], texel)              # one select, one store
    out_ref[3:4, :] = jnp.ones((1, P), jnp.float32)                     # alpha row


@jax.jit
def simple_shader(pix_to_face, bary_coords, face_vertex_colors, background_color):
    """JAX wrapper reproducing SimpleShader.forward.

    pix_to_face        : (N, H, W, K) int32   (-1 = no face)
    bary_coords        : (N, H, W, K, 3) float32
    face_vertex_colors : (NUM_FACES, 3, C) float32  (TexturesVertex per face)
    background_color   : (C,) float32
    returns            : (N, H, W, 4) float32 RGBA
    """
    n, h, w, _ = pix_to_face.shape
    P = n * h * w
    num_faces = face_vertex_colors.shape[0]

    # One stacked per-pixel slab (single DMA): rows 0-2 bary(k=0), row 3 p2f as f32.
    bary0 = bary_coords[..., 0, :].reshape(P, 3).astype(jnp.float32).T        # (3, P)
    p2f0 = pix_to_face[..., 0].reshape(1, P).astype(jnp.float32)              # (1, P)
    slab = jnp.concatenate([bary0, p2f0], axis=0)                             # (4, P)

    # One-time color table: (vertex, channel, face) with each vertex block padded
    # to VROW rows so its channels start at sublane 0 of a tile inside the kernel.
    colors_vcf = jnp.transpose(face_vertex_colors.astype(jnp.float32),
                               (1, 2, 0))                                     # (3, C, F)
    colors_T = (jnp.zeros((3, VROW, num_faces), jnp.float32)
                .at[:, :C, :].set(colors_vcf)
                .reshape(3 * VROW, num_faces))                                # (24, F)

    bg = background_color.astype(jnp.float32).reshape(C, 1)                   # (3, 1)

    flops = 2 * (3 * VROW) * num_faces * P + 8 * P
    bytes_accessed = (4 * P + 4 * P + 3 * VROW * num_faces + C) * 4

    out_pl = pl.pallas_call(
        _shader_kernel,
        out_shape=jax.ShapeDtypeStruct((C + 1, P), jnp.float32),
        in_specs=[
            pl.BlockSpec(memory_space=pltpu.MemorySpace.VMEM),   # slab   (4, P)
            pl.BlockSpec(memory_space=pltpu.MemorySpace.VMEM),   # colors (24, F)
            pl.BlockSpec(memory_space=pltpu.MemorySpace.VMEM),   # bg     (3, 1)
        ],
        out_specs=pl.BlockSpec(memory_space=pltpu.MemorySpace.VMEM),
        cost_estimate=pl.CostEstimate(flops=flops, transcendentals=0,
                                      bytes_accessed=bytes_accessed),
    )(slab, colors_T, bg)

    # Consumer expects NHWC like PyTorch3D; at production sizes prefer returning
    # the channel-planar slab (see TODO at top of file).
    return out_pl.T.reshape(n, h, w, C + 1)


def _reference(pix_to_face, bary_coords, face_vertex_colors, background_color):
    """Pure-JAX reference (PyTorch3D sample_textures + hard_rgb_blend)."""
    safe_idx = jnp.clip(pix_to_face, 0, face_vertex_colors.shape[0] - 1)
    gathered = face_vertex_colors[safe_idx]                       # (N,H,W,K,3,C)
    texels = jnp.sum(bary_coords[..., None] * gathered, axis=-2)  # (N,H,W,K,C)
    is_bg = pix_to_face[..., 0] < 0                               # (N,H,W)
    pixel = jnp.where(is_bg[..., None], background_color, texels[..., 0, :])
    alpha = jnp.ones_like(pixel[..., :1])   # hard_rgb_blend: alpha = 1 everywhere
    return jnp.concatenate([pixel, alpha], axis=-1)


if __name__ == "__main__":
    key = jax.random.PRNGKey(0)
    k1, k2, k3 = jax.random.split(key, 3)

    # Synthetic rasterizer fragments.
    pix_to_face = jax.random.randint(k1, (N, H, W, K), minval=-1,
                                     maxval=NUM_FACES, dtype=jnp.int32)
    bary_raw = jax.random.uniform(k2, (N, H, W, K, 3), dtype=jnp.float32) + 1e-3
    bary_coords = bary_raw / jnp.sum(bary_raw, axis=-1, keepdims=True)

    # Deterministic "texture" parameters: per-face per-vertex RGB colors.
    face_vertex_colors = jax.random.uniform(k3, (NUM_FACES, 3, C),
                                            dtype=jnp.float32)
    # Default BlendParams background_color = [0, 0, 0].
    background_color = jnp.zeros((C,), dtype=jnp.float32)

    out = simple_shader(pix_to_face, bary_coords, face_vertex_colors,
                        background_color)
    out = jax.block_until_ready(out)

    ref = _reference(pix_to_face, bary_coords, face_vertex_colors,
                     background_color)
    assert out.shape == (N, H, W, 4)
    assert jnp.allclose(out, ref, atol=1e-5, rtol=1e-5)

    print("KERNEL_OK")
</pallas_src>

<mosaic_0001>
module attributes {stable_mosaic.version = 11 : i64} {
  func.func @_shader_kernel(%arg0: memref<4x512xf32, #tpu.memory_space<vmem>>, %arg1: memref<24x64xf32, #tpu.memory_space<vmem>>, %arg2: memref<3x1xf32, #tpu.memory_space<vmem>>, %arg3: memref<4x512xf32, #tpu.memory_space<vmem>>) attributes {dimension_semantics = [], scalar_prefetch = 0 : i64, scratch_operands = 0 : i64, tpu.core_type = #tpu.core_type<tc>} {
    %c3 = arith.constant 3 : index
    %c0 = arith.constant 0 : index
    %0 = vector.load %arg0[%c3, %c0] : memref<4x512xf32, #tpu.memory_space<vmem>>, vector<1x512xf32>
    %1 = arith.fptosi %0 : vector<1x512xf32> to vector<1x512xi32>
    %2 = tpu.iota {dimensions = array<i32: 0>} : vector<64x512xi32>
    %3 = vector.broadcast %1 : vector<1x512xi32> to vector<64x512xi32>
    %4 = arith.cmpi eq, %2, %3 : vector<64x512xi32>
    %5 = arith.extui %4 : vector<64x512xi1> to vector<64x512xi32>
    %6 = arith.sitofp %5 : vector<64x512xi32> to vector<64x512xf32>
    %c0_0 = arith.constant 0 : index
    %c0_1 = arith.constant 0 : index
    %7 = vector.load %arg1[%c0_0, %c0_1] : memref<24x64xf32, #tpu.memory_space<vmem>>, vector<24x64xf32>
    %cst = arith.constant dense<0.000000e+00> : vector<24x512xf32>
    %8 = tpu.matmul %7, %6, %cst {dimension_numbers = #tpu.dot_dimension_numbers<[1], [0], [0], [1], [0, 0, 1, 1], [], []>, precision = #tpu.contract_precision<fp32>} : vector<24x64xf32>, vector<64x512xf32>, vector<24x512xf32> -> vector<24x512xf32>
    %c0_2 = arith.constant 0 : index
    %c0_3 = arith.constant 0 : index
    %9 = vector.load %arg0[%c0_2, %c0_3] : memref<4x512xf32, #tpu.memory_space<vmem>>, vector<1x512xf32>
    %10 = vector.extract_strided_slice %8 {offsets = [0, 0], sizes = [3, 512], strides = [1, 1]} : vector<24x512xf32> to vector<3x512xf32>
    %11 = vector.broadcast %9 : vector<1x512xf32> to vector<3x512xf32>
    %12 = arith.mulf %11, %10 : vector<3x512xf32>
    %c1 = arith.constant 1 : index
    %c0_4 = arith.constant 0 : index
    %13 = vector.load %arg0[%c1, %c0_4] : memref<4x512xf32, #tpu.memory_space<vmem>>, vector<1x512xf32>
    %14 = vector.extract_strided_slice %8 {offsets = [8, 0], sizes = [3, 512], strides = [1, 1]} : vector<24x512xf32> to vector<3x512xf32>
    %15 = vector.broadcast %13 : vector<1x512xf32> to vector<3x512xf32>
    %16 = arith.mulf %15, %14 : vector<3x512xf32>
    %17 = arith.addf %12, %16 : vector<3x512xf32>
    %c2 = arith.constant 2 : index
    %c0_5 = arith.constant 0 : index
    %18 = vector.load %arg0[%c2, %c0_5] : memref<4x512xf32, #tpu.memory_space<vmem>>, vector<1x512xf32>
    %19 = vector.extract_strided_slice %8 {offsets = [16, 0], sizes = [3, 512], strides = [1, 1]} : vector<24x512xf32> to vector<3x512xf32>
    %20 = vector.broadcast %18 : vector<1x512xf32> to vector<3x512xf32>
    %21 = arith.mulf %20, %19 : vector<3x512xf32>
    %22 = arith.addf %17, %21 : vector<3x512xf32>
    %cst_6 = arith.constant 0.000000e+00 : f32
    %23 = vector.broadcast %cst_6 : f32 to vector<1x512xf32>
    %24 = arith.cmpf olt, %0, %23 : vector<1x512xf32>
    %c0_7 = arith.constant 0 : index
    %c0_8 = arith.constant 0 : index
    %25 = vector.load %arg2[%c0_7, %c0_8] : memref<3x1xf32, #tpu.memory_space<vmem>>, vector<3x1xf32>
    %26 = vector.shape_cast %24 : vector<1x512xi1> to vector<1x512xi1>
    %27 = vector.broadcast %26 : vector<1x512xi1> to vector<3x512xi1>
    %28 = vector.shape_cast %25 : vector<3x1xf32> to vector<3x1xf32>
    %29 = vector.broadcast %28 : vector<3x1xf32> to vector<3x512xf32>
    %30 = arith.select %27, %29, %22 : vector<3x512xi1>, vector<3x512xf32>
    %c0_9 = arith.constant 0 : index
    %c0_10 = arith.constant 0 : index
    %31 = vector.load %arg3[%c0_9, %c0_10] : memref<4x512xf32, #tpu.memory_space<vmem>>, vector<3x512xf32>
    tpu.vector_store %arg3[%c0_9, %c0_10], %30 {strides = array<i32>} : memref<4x512xf32, #tpu.memory_space<vmem>>, vector<3x512xf32>,
    %cst_11 = arith.constant 1.000000e+00 : f32
    %32 = vector.broadcast %cst_11 : f32 to vector<1x512xf32>
    %c3_12 = arith.constant 3 : index
    %c0_13 = arith.constant 0 : index
    %33 = vector.load %arg3[%c3_12, %c0_13] : memref<4x512xf32, #tpu.memory_space<vmem>>, vector<1x512xf32>
    tpu.vector_store %arg3[%c3_12, %c0_13], %32 {strides = array<i32>} : memref<4x512xf32, #tpu.memory_space<vmem>>, vector<1x512xf32>,
    return
  }
}

</mosaic_0001>

<bundles_post_ra>
// kernel: squeeze.2
= control target key start
LH: loop header
LB: loop body
LE: loop exit
PB: predicated region body
PF: predicated region fallthrough
CT: control target
= control target key end

     0   :  { %vm52_vm0 = vcmask 1042434   ;;  %vm56_vm1 = vcmask 1043459   ;;  %s98_s6 = smov 3  ;;  %s48_s13 = smov 3  ;;  %vm19_vm2 = vcmask 1041409   ;;  %vm24_vm3 = vcmask 1043458   ;;  %s744_s0 = inlined_call_operand.vmem [shape: f32[2,16,16,1,3], index: 0, kind: input, shape index: {}]   ;;  %s745_s1 = inlined_call_operand.vmem [shape: f32[512,3], index: 1, kind: output, shape index: {}]  }
   0x1   :  { %v407_v0 = vld [vmem:[%s744_s0 + $0x3c] sm:$0x4]   ;;  %v397_v4 = vld [vmem:[%s744_s0 + $0x57] ss:$-56 sm:%s48_s13]   ;;  %v400_v9 = vld [vmem:[%s744_s0 + $0x6] sm:$0x1]  }
   0x2   :  { %v406_v1 = vld [vmem:[%s744_s0 + $0x56] ss:$-56 sm:%s98_s6]   ;;  %v398_v5 = vld [vmem:[%s744_s0 + $0x3d] sm:$0x4]   ;;  %s464_s24 = smov 96   ;;  %vm28_vm4 = vcmask 1044484  }
   0x3   :  { %v408_v2 = vld [vmem:[%s744_s0 + $0x5b] sm:$0x8]   ;;  %v103_v3 = vsel %vm52_vm0, %v407_v0, %v406_v1  ;;  %v399_v6 = vld [vmem:[%s744_s0 + $0x5c] sm:$0x8]   ;;  %v53_v8 = vsel %vm52_vm0, %v398_v5, %v397_v4  ;;  %v401_v10 = vld [vmem:[%s744_s0 + $0x25] sm:$0x2]  }
   0x4   :  { %v107_v7 = vsel %vm56_vm1, %v408_v2, %v103_v3  ;;  %v57_v11 = vsel %vm56_vm1, %v399_v6, %v53_v8  ;;  %vm33_vm5 = vcmask 1046533   ;;  %vm37_vm6 = vcmask 1047559   ;;  %s72_s25 = smov 12  ;;  %v403_v12 = vld [vmem:[%s744_s0 + $0x2a] sm:$0x10]   ;;  %s465_s28 = smov 112  }
   0x5   :  { %108 = vrot.lane.b32.xlu1 %v107_v7, %s464_s24  ;;  %58 = vrot.lane.b32.xlu0 %v57_v11, %s465_s28  ;;  %v70_v13 = vsel %vm19_vm2, %v401_v10, %v400_v9  ;;  %v402_v14 = vld [vmem:[%s744_s0 + $0xb6] ss:$-56 sm:%s72_s25]   ;;  %s81_s2 = smov 96  ;;  %s22_s5 = smov 12  ;;  %vm4_vm7 = vcmask 1047556   ;;  %vm6_vm8 = vcmask 130048  }
   0x6   :  { %v405_v15 = vld [vmem:[%s744_s0 + $0x2f] sm:$0x80]   ;;  %v75_v16 = vsel %vm24_vm3, %v402_v14, %v70_v13  ;;  %v391_v18 = vld [vmem:[%s744_s0 + $0x7] sm:$0x1]   ;;  %v394_v23 = vld [vmem:[%s744_s0 + $0x2b] sm:$0x10]  }
   0x7   :  { %v404_v17 = vld [vmem:[%s744_s0 + $0x166] ss:$-56 sm:%s81_s2]   ;;  %v392_v19 = vld [vmem:[%s744_s0 + $0x26] sm:$0x2]   ;;  %v79_v20 = vsel %vm28_vm4, %v403_v12, %v75_v16  ;;  %s31_s16 = smov 96  ;;  %s148_s21 = smov 3 }
   0x8   :  { %v20_v21 = vsel %vm19_vm2, %v392_v19, %v391_v18  ;;  %v393_v22 = vld [vmem:[%s744_s0 + $0xb7] ss:$-56 sm:%s22_s5]   ;;  %v84_v24 = vsel %vm33_vm5, %v404_v17, %v79_v20  ;;  %s122_s22 = smov 12  ;;  %v415_v30 = vld [vmem:[%s744_s0 + $0x55] ss:$-56 sm:%s148_s21]   ;;  %s131_s9 = smov 96 }
   0x9   :  { %v25_v25 = vsel %vm24_vm3, %v393_v22, %v20_v21  ;;  %v395_v26 = vld [vmem:[%s744_s0 + $0x167] ss:$-56 sm:%s31_s16]   ;;  %v88_v28 = vsel %vm37_vm6, %v405_v15, %v84_v24  ;;  %v416_v31 = vld [vmem:[%s744_s0 + $0x3b] sm:$0x4]   ;;  %v409_v35 = vld [vmem:[%s744_s0 + $0x5] sm:$0x1]  }
   0xa   :  { %v396_v27 = vld [vmem:[%s744_s0 + $0x30] sm:$0x80]   ;;  %v29_v29 = vsel %vm28_vm4, %v394_v23, %v25_v25  ;;  %v417_v32 = vld [vmem:[%s744_s0 + $0x5a] sm:$0x8]   ;;  %89 = vrot.lane.b32.xlu1 %v88_v28, %s464_s24  ;;  %v153_v34 = vsel %vm52_vm0, %v416_v31, %v415_v30  ;;  %v410_v36 = vld [vmem:[%s744_s0 + $0x24] sm:$0x2]  }
   0xb   :  { %v34_v33 = vsel %vm33_vm5, %v395_v26, %v29_v29  ;;  %v412_v37 = vld [vmem:[%s744_s0 + $0x29] sm:$0x10]   ;;  %v157_v39 = vsel %vm56_vm1, %v417_v32, %v153_v34  ;;  %v120_v40 = vsel %vm19_vm2, %v410_v36, %v409_v35  ;;  %v414_v42 = vld [vmem:[%s744_s0 + $0x2e] sm:$0x80]   ;;  %s198_s13 = smov 3  ;;  %s172_s16 = smov 12 }
   0xc   :  { %v38_v38 = vsel %vm37_vm6, %v396_v27, %v34_v33  ;;  %v411_v41 = vld [vmem:[%s744_s0 + $0xb5] ss:$-56 sm:%s122_s22]   ;;  %v425_v45 = vld [vmem:[%s744_s0 + $0x3a] sm:$0x4]   ;;  %v418_v49 = vld [vmem:[%s744_s0 + $0x4] sm:$0x1]  }
   0xd   :  { %39 = vrot.lane.b32.xlu0 %v38_v38, %s465_s28  ;;  %v125_v43 = vsel %vm24_vm3, %v411_v41, %v120_v40  ;;  %v413_v44 = vld [vmem:[%s744_s0 + $0x165] ss:$-56 sm:%s131_s9]   ;;  %v426_v48 = vld [vmem:[%s744_s0 + $0x59] sm:$0x8]   ;;  %s466_s23 = smov 80   ;;  %s181_s30 = smov 96 }
   0xe   :  { %v129_v46 = vsel %vm28_vm4, %v412_v37, %v125_v43  ;;  %v424_v47 = vld [vmem:[%s744_s0 + $0x54] ss:$-56 sm:%s198_s13]   ;;  %158 = vrot.lane.b32.xlu1 %v157_v39, %s466_s23  ;;  %s248_s7 = smov 3  ;;  %v434_v61 = vld [vmem:[%s744_s0 + $0x39] sm:$0x4]   ;;  %s222_s28 = smov 12 }
   0xf   :  { %v134_v50 = vsel %vm33_vm5, %v413_v44, %v129_v46  ;;  %v203_v51 = vsel %vm52_vm0, %v425_v45, %v424_v47  ;;  %v419_v52 = vld [vmem:[%s744_s0 + $0x23] sm:$0x2]   ;;  %v421_v57 = vld [vmem:[%s744_s0 + $0x28] sm:$0x10]   ;;  %v423_v59 = vld [vmem:[%s744_s0 + $0x2d] sm:$0x80]  }
  0x10   :  { %v420_v53 = vld [vmem:[%s744_s0 + $0xb4] ss:$-56 sm:%s172_s16]   ;;  %v138_v54 = vsel %vm37_vm6, %v414_v42, %v134_v50  ;;  %v207_v55 = vsel %vm56_vm1, %v426_v48, %v203_v51  ;;  %v170_v56 = vsel %vm19_vm2, %v419_v52, %v418_v49  ;;  %v435_v62 = vld [vmem:[%s744_s0 + $0x58] sm:$0x8]   ;;  %v427_v1 = vld [vmem:[%s744_s0 + $0x3] sm:$0x1]  }
  0x11   :  { %v422_v58 = vld [vmem:[%s744_s0 + $0x164] ss:$-56 sm:%s181_s30]   ;;  %139 = vrot.lane.b32.xlu0 %v138_v54, %s466_s23  ;;  %v175_v60 = vsel %vm24_vm3, %v420_v53, %v170_v56  ;;  %v428_v2 = vld [vmem:[%s744_s0 + $0x22] sm:$0x2]   ;;  %s467_s18 = smov 64   ;;  %s231_s23 = smov 96 }
  0x12   :  { %v179_v63 = vsel %vm28_vm4, %v421_v57, %v175_v60  ;;  %v433_v0 = vld [vmem:[%s744_s0 + $0x53] ss:$-56 sm:%s248_s7]   ;;  %208 = vrot.lane.b32.xlu1 %v207_v55, %s467_s18  ;;  %v220_v5 = vsel %vm19_vm2, %v428_v2, %v427_v1  ;;  %s298_s30 = smov 3  ;;  %s272_s24 = smov 12  ;;  %v443_v15 = vld [vmem:[%s744_s0 + $0x38] sm:$0x4]  }
  0x13   :  { %v184_v3 = vsel %vm33_vm5, %v422_v58, %v179_v63  ;;  %v253_v4 = vsel %vm52_vm0, %v434_v61, %v433_v0  ;;  %v429_v6 = vld [vmem:[%s744_s0 + $0xb3] ss:$-56 sm:%s222_s28]   ;;  %v442_v14 = vld [vmem:[%s744_s0 + $0x52] ss:$-56 sm:%s298_s30]   ;;  %s281_s6 = smov 96  ;;  %s468_s12 = smov 48  }
  0x14   :  { %v430_v7 = vld [vmem:[%s744_s0 + $0x27] sm:$0x10]   ;;  %v188_v8 = vsel %vm37_vm6, %v423_v59, %v184_v3  ;;  %v257_v9 = vsel %vm56_vm1, %v435_v62, %v253_v4  ;;  %v225_v10 = vsel %vm24_vm3, %v429_v6, %v220_v5  ;;  %v432_v12 = vld [vmem:[%s744_s0 + $0x2c] sm:$0x80]   ;;  %v303_v17 = vsel %vm52_vm0, %v443_v15, %v442_v14  ;;  %v444_v18 = vld [vmem:[%s744_s0 + $0x57] sm:$0x8]  }
  0x15   :  { %v431_v11 = vld [vmem:[%s744_s0 + $0x163] ss:$-56 sm:%s231_s23]   ;;  %189 = vrot.lane.b32.xlu0 %v188_v8, %s467_s18  ;;  %v229_v13 = vsel %vm28_vm4, %v430_v7, %v225_v10  ;;  %v436_v19 = vld [vmem:[%s744_s0 + $0x2] sm:$0x1]   ;;  %s348_s17 = smov 3  ;;  %s322_s18 = smov 12  ;;  %v307_v25 = vsel %vm56_vm1, %v444_v18, %v303_v17 }
  0x16   :  { %v234_v16 = vsel %vm33_vm5, %v431_v11, %v229_v13  ;;  %v437_v20 = vld [vmem:[%s744_s0 + $0x21] sm:$0x2]   ;;  %258 = vrot.lane.b32.xlu1 %v257_v9, %s468_s12  ;;  %v439_v24 = vld [vmem:[%s744_s0 + $0x26] sm:$0x10]   ;;  %v441_v28 = vld [vmem:[%s744_s0 + $0x2b] sm:$0x80]  }
  0x17   :  { %v238_v21 = vsel %vm37_vm6, %v432_v12, %v234_v16  ;;  %v270_v22 = vsel %vm19_vm2, %v437_v20, %v436_v19  ;;  %v438_v23 = vld [vmem:[%s744_s0 + $0xb2] ss:$-56 sm:%s272_s24]   ;;  %v452_v29 = vld [vmem:[%s744_s0 + $0x37] sm:$0x4]   ;;  %s331_s24 = smov 96  ;;  %s469_s8 = smov 32  }
  0x18   :  { %v275_v26 = vsel %vm24_vm3, %v438_v23, %v270_v22  ;;  %v440_v27 = vld [vmem:[%s744_s0 + $0x162] ss:$-56 sm:%s281_s6]   ;;  %v451_v31 = vld [vmem:[%s744_s0 + $0x51] ss:$-56 sm:%s348_s17]   ;;  %vm41_vm9 = vcmask 1048448   ;;  %vm91_vm10 = vcmask 917248  }
  0x19   :  { %239 = vrot.lane.b32.xlu0 %v238_v21, %s468_s12  ;;  %v279_v30 = vsel %vm28_vm4, %v439_v24, %v275_v26  ;;  %v453_v32 = vld [vmem:[%s744_s0 + $0x56] sm:$0x8]   ;;  %v353_v34 = vsel %vm52_vm0, %v452_v29, %v451_v31  ;;  %v445_v35 = vld [vmem:[%s744_s0 + $0x1] sm:$0x1]   ;;  %v448_v40 = vld [vmem:[%s744_s0 + $0x25] sm:$0x10]  }
  0x1a   :  { %v284_v33 = vsel %vm33_vm5, %v440_v27, %v279_v30  ;;  %v446_v36 = vld [vmem:[%s744_s0 + $0x20] sm:$0x2]   ;;  %308 = vrot.lane.b32.xlu1 %v307_v25, %s469_s8  ;;  %v357_v42 = vsel %vm56_vm1, %v453_v32, %v353_v34  ;;  %v450_v44 = vld [vmem:[%s744_s0 + $0x2a] sm:$0x80]   ;;  %vm141_vm11 = vcmask 786048   ;;  %vm191_vm12 = vcmask 654848  }
  0x1b   :  { %v447_v37 = vld [vmem:[%s744_s0 + $0xb1] ss:$-56 sm:%s322_s18]   ;;  %v288_v38 = vsel %vm37_vm6, %v441_v28, %v284_v33  ;;  %v320_v39 = vsel %vm19_vm2, %v446_v36, %v445_v35  ;;  %v2_v45 = vld [vmem:[%s744_s0] ss:$8 sm:$0xf]   ;;  %vm241_vm13 = vcmask 523648  }
  0x1c   :  { %v449_v41 = vld [vmem:[%s744_s0 + $0x161] ss:$-56 sm:%s331_s24]   ;;  %v325_v43 = vsel %vm24_vm3, %v447_v37, %v320_v39  ;;  %v3_v47 = vld [vmem:[%s744_s0] ss:$8 sm:$0xf0]   ;;  %vm291_vm14 = vcmask 392448  }
  0x1d   :  { %289 = vrot.lane.b32.xlu0 %v288_v38, %s469_s8  ;;  %v329_v46 = vsel %vm28_vm4, %v448_v40, %v325_v43  ;;  %v5_v49 = vsel %vm4_vm7, %v3_v47, %v2_v45  ;;  %v390_v50 = vld [vmem:[%s744_s0 + $0x40] ss:$8 sm:$0xf]   ;;  %s470_s0 = smov 16   ;;  %vm341_vm15 = vcmask 261248  }
  0x1e   :  { %v334_v48 = vsel %vm33_vm5, %v449_v41, %v329_v46  ;;  %358 = vrot.lane.b32.xlu1 %v357_v42, %s470_s0  ;;  %7 = vst.msk [vmem:[#allocation0] ss:$8 sm:$0xf] %vm6_vm8, %v5_v49   ;;  %9 = vst.msk [vmem:[#allocation0 - $0x1f] ss:$8 sm:$0xf0] %vm6_vm8, %v5_v49  }
  0x1f   :  { %v338_v51 = vsel %vm37_vm6, %v450_v44, %v334_v48  ;;  %14 = vst.msk [vmem:[#allocation0 + $0x2] ss:$8 sm:$0xf] %vm6_vm8, %v390_v50  }
  0x21   :  { %339 = vrot.lane.b32.xlu0 %v338_v51, %s470_s0 }
  0x77   :  { %v109_v52 = vpop.permute.xlu1 %108   ;;  %v59_v53 = vpop.permute.xlu0 %58  }
  0x78   :  { %62 = vst.msk [vmem:[#allocation0 + $0x12] ss:$6 sm:$0x3] %vm41_vm9, %v59_v53   ;;  %64 = vst.msk [vmem:[#allocation0 + $0x17] sm:$0xc] %vm41_vm9, %v59_v53  }
  0x79   :  { %112 = vst.msk [vmem:[#allocation0 + $0x12] ss:$6 sm:$0x3] %vm91_vm10, %v109_v52   ;;  %114 = vst.msk [vmem:[#allocation0 + $0x17] sm:$0xc] %vm91_vm10, %v109_v52  }
  0x7c   :  { %v90_v54 = vpop.permute.xlu1 %89  }
  0x7f   :  { %v40_v55 = vpop.permute.xlu0 %39  }
  0x80   :  { %42 = vst.msk [vmem:[#allocation0] sm:$0x7] %vm41_vm9, %v40_v55   ;;  %44 = vst.msk [vmem:[#allocation0 + $0x5] sm:$0x38] %vm41_vm9, %v40_v55   ;;  %v159_v56 = vpop.permute.xlu1 %158  }
  0x81   :  { %46 = vst.msk [vmem:[#allocation0 + $0xa] sm:$0xc0] %vm41_vm9, %v40_v55  }
  0x82   :  { %92 = vst.msk [vmem:[#allocation0] sm:$0x7] %vm91_vm10, %v90_v54   ;;  %94 = vst.msk [vmem:[#allocation0 + $0x5] sm:$0x38] %vm91_vm10, %v90_v54  }
  0x83   :  { %96 = vst.msk [vmem:[#allocation0 + $0xa] sm:$0xc0] %vm91_vm10, %v90_v54   ;;  %v140_v57 = vpop.permute.xlu0 %139  }
  0x84   :  { %162 = vst.msk [vmem:[#allocation0 + $0x12] ss:$6 sm:$0x3] %vm141_vm11, %v159_v56   ;;  %164 = vst.msk [vmem:[#allocation0 + $0x17] sm:$0xc] %vm141_vm11, %v159_v56   ;;  %v209_v58 = vpop.permute.xlu1 %208  }
  0x85   :  { %142 = vst.msk [vmem:[#allocation0] sm:$0x7] %vm141_vm11, %v140_v57   ;;  %144 = vst.msk [vmem:[#allocation0 + $0x5] sm:$0x38] %vm141_vm11, %v140_v57  }
  0x86   :  { %146 = vst.msk [vmem:[#allocation0 + $0xa] sm:$0xc0] %vm141_vm11, %v140_v57  }
  0x87   :  { %212 = vst.msk [vmem:[#allocation0 + $0x12] ss:$6 sm:$0x3] %vm191_vm12, %v209_v58   ;;  %214 = vst.msk [vmem:[#allocation0 + $0x17] sm:$0xc] %vm191_vm12, %v209_v58   ;;  %v190_v59 = vpop.permute.xlu0 %189  }
  0x88   :  { %192 = vst.msk [vmem:[#allocation0] sm:$0x7] %vm191_vm12, %v190_v59   ;;  %194 = vst.msk [vmem:[#allocation0 + $0x5] sm:$0x38] %vm191_vm12, %v190_v59   ;;  %v259_v60 = vpop.permute.xlu1 %258  }
  0x89   :  { %196 = vst.msk [vmem:[#allocation0 + $0xa] sm:$0xc0] %vm191_vm12, %v190_v59  }
  0x8a   :  { %262 = vst.msk [vmem:[#allocation0 + $0x12] ss:$6 sm:$0x3] %vm241_vm13, %v259_v60   ;;  %264 = vst.msk [vmem:[#allocation0 + $0x17] sm:$0xc] %vm241_vm13, %v259_v60  }
  0x8b   :  { %v240_v61 = vpop.permute.xlu0 %239  }
  0x8c   :  { %242 = vst.msk [vmem:[#allocation0] sm:$0x7] %vm241_vm13, %v240_v61   ;;  %244 = vst.msk [vmem:[#allocation0 + $0x5] sm:$0x38] %vm241_vm13, %v240_v61   ;;  %v309_v62 = vpop.permute.xlu1 %308  }
  0x8d   :  { %246 = vst.msk [vmem:[#allocation0 + $0xa] sm:$0xc0] %vm241_vm13, %v240_v61  }
  0x8e   :  { %312 = vst.msk [vmem:[#allocation0 + $0x12] ss:$6 sm:$0x3] %vm291_vm14, %v309_v62   ;;  %314 = vst.msk [vmem:[#allocation0 + $0x17] sm:$0xc] %vm291_vm14, %v309_v62  }
  0x8f   :  { %v290_v63 = vpop.permute.xlu0 %289  }
  0x90   :  { %292 = vst.msk [vmem:[#allocation0] sm:$0x7] %vm291_vm14, %v290_v63   ;;  %294 = vst.msk [vmem:[#allocation0 + $0x5] sm:$0x38] %vm291_vm14, %v290_v63   ;;  %v359_v0 = vpop.permute.xlu1 %358  }
  0x91   :  { %296 = vst.msk [vmem:[#allocation0 + $0xa] sm:$0xc0] %vm291_vm14, %v290_v63  }
  0x92   :  { %362 = vst.msk [vmem:[#allocation0 + $0x12] ss:$6 sm:$0x3] %vm341_vm15, %v359_v0   ;;  %364 = vst.msk [vmem:[#allocation0 + $0x17] sm:$0xc] %vm341_vm15, %v359_v0  }
  0x93   :  { %v340_v1 = vpop.permute.xlu0 %339  }
  0x94   :  { %342 = vst.msk [vmem:[#allocation0] sm:$0x7] %vm341_vm15, %v340_v1   ;;  %344 = vst.msk [vmem:[#allocation0 + $0x5] sm:$0x38] %vm341_vm15, %v340_v1  }
  0x95   :  { %346 = vst.msk [vmem:[#allocation0 + $0xa] sm:$0xc0] %vm341_vm15, %v340_v1  }
  0x99   :  { %v383_v2 = vld [vmem:[#allocation0 + $0x18] sm:$0xf] }
  0x9a   :  { %456 = vst [vmem:[%s745_s1 + $0xc] sm:$0xf] %v383_v2 }
  0x9b   :  { %v368_v3 = vld [vmem:[#allocation0] sm:$0xf]  ;;  %v372_v4 = vld [vmem:[#allocation0 + $0x8] sm:$0xf] }
  0x9c   :  { %v377_v5 = vld [vmem:[#allocation0 + $0x10] sm:$0xf]  ;;  %370 = vst [vmem:[%s745_s1] sm:$0xf] %v368_v3  ;;  %454 = vst [vmem:[%s745_s1 + $0x4] sm:$0xf] %v372_v4 }
  0x9d   :  { %455 = vst [vmem:[%s745_s1 + $0x8] sm:$0xf] %v377_v5 }

// kernel: simple_shader.1
= control target key start
LH: loop header
LB: loop body
LE: loop exit
PB: predicated region body
PF: predicated region fallthrough
CT: control target
= control target key end

     0   :  { %v3001_v0 = vlaneseq  ;;  %vm141_vm0 = vcmask 523264   ;;  %v3024_v2 = vmov 0.0   ;;  %v3016_v34 = vmov 1.0|1.0   ;;  %s2997_s0 = inlined_call_operand.vmem [shape: f32[4,512], index: 0, kind: input, shape index: {}]   ;;  %s2998_s1 = inlined_call_operand.vmem [shape: f32[24,64], index: 1, kind: input, shape index: {}]   ;;  %s2999_s2 = inlined_call_operand.vmem [shape: f32[3,1], index: 2, kind: input, shape index: {}]   ;;  %s3000_s3 = inlined_call_operand.vmem [shape: f32[4,512], index: 3, kind: output, shape index: {}]  }
   0x1   :  { %v2199_v1 = vld [vmem:[%s2997_s0 + $0x3] ss:$4 sm:$0xf]  ;;  %231 = vmatprep.mubr.f32.mxu0 %v3024_v2  ;;  %976 = vmatprep.mubr.f32.mxu1 %v3024_v2  ;;  %v140_v9 = vld [vmem:[%s2998_s1 + $0x10] sm:$0xff]  ;;  %v3082_v47 = vmov 0  ;;  %v3085_v54 = vmov 0 }
   0x2   :  { %3071 = vst [vmem:[#allocation2_spill] sm:$0xff] %v2199_v1  ;;  %v138_v3 = vld [vmem:[%s2998_s1] sm:$0xff]  ;;  %v139_v4 = vld [vmem:[%s2998_s1 + $0x8] sm:$0xff]  ;;  %v2165_v5 = vtrunc.f32 %v2199_v1  ;;  %v18_v6 = vshrl.u32 %v3001_v0, 7  ;;  %v2224_v12 = vsel %vm141_vm0, %v140_v9, 0  ;;  %v3088_v59 = vmov 0 }
   0x3   :  { %v2211_v7 = vsel %vm141_vm0, %v138_v3, 0  ;;  %v2213_v8 = vsel %vm141_vm0, %v139_v4, 0  ;;  %v2175_v31 = vmov 1.0   ;;  %v1910_v37 = vld [vmem:[%s2997_s0 + $0x1] ss:$4 sm:$0xf] }
   0x4   :  { %v2219_v10 = vand.u32 4294901760, %v2211_v7  ;;  %v2222_v11 = vand.u32 4294901760, %v2213_v8  ;;  %v2166_v13 = vcvt.f32.s32 %v2165_v5  ;;  %v19_v14 = vadd.s32 8, %v18_v6 }
   0x5   :  { %v2226_v15 = vsub.s32 1, %v18_v6  ;;  %v2228_v16 = vsub.s32 3, %v18_v6  ;;  %v2230_v17 = vsub.s32 0, %v18_v6  ;;  %v2232_v18 = vsub.s32 2, %v18_v6 }
   0x6   :  { %v2234_v19 = vadd.s32 16, %v18_v6  ;;  %v2236_v20 = vadd.s32 24, %v18_v6  ;;  %v2244_v23 = vadd.s32 32, %v18_v6  ;;  %v2246_v24 = vadd.s32 40, %v18_v6 }
   0x7   :  { %3072 = vst [vmem:[#allocation3_spill] sm:$0xff] %v2226_v15  ;;  %3073 = vst [vmem:[#allocation4_spill] sm:$0xff] %v2228_v16  ;;  %v2239_v21 = vrot.slane %v2166_v13, %v2226_v15  ;;  %v2242_v22 = vrot.slane %v2166_v13, %v2228_v16  ;;  %v2249_v25 = vrot.slane %v2166_v13, %v2230_v17  ;;  %v2254_v27 = vadd.s32 48, %v18_v6 }
   0x8   :  { %3074 = vst [vmem:[#allocation5_spill] sm:$0xff] %v2230_v17  ;;  %3075 = vst [vmem:[#allocation6_spill] sm:$0xff] %v2232_v18  ;;  %v2252_v26 = vrot.slane %v2166_v13, %v2232_v18  ;;  %v2256_v28 = vadd.s32 56, %v18_v6  ;;  %v3109_v13 = vmov 0  ;;  %v3118_v18 = vmov 1.0|1.0  }
   0x9   :  { %vm43_vm1 = vcmp.eq.s32.totalorder %v18_v6, %v2239_v21  ;;  %vm47_vm2 = vcmp.eq.s32.totalorder %v19_v14, %v2239_v21  ;;  %vm45_vm3 = vcmp.eq.s32.totalorder %v18_v6, %v2242_v22  ;;  %vm49_vm4 = vcmp.eq.s32.totalorder %v19_v14, %v2242_v22 }
   0xa   :  { %v1783_v29 = vsel %vm43_vm1, 1.0, %v3024_v2  ;;  %v1787_v30 = vsel %vm47_vm2, 1.0, %v3024_v2  ;;  %vm2264_vm5 = vmpackc.low %vm47_vm2, %vm43_vm1  ;;  %v1785_v32 = vsel %vm45_vm3, 1.0, %v3024_v2  ;;  %v1789_v33 = vsel %vm49_vm4, 1.0, %v3024_v2 }
   0xb   :  { %1914 = vmatprep.subr.msk.bf16.mxu0 %vm2264_vm5, %v3016_v34  ;;  %v2273_v35 = vsub.f32 %v1783_v29, %v1783_v29  ;;  %v2275_v36 = vsub.f32 %v1787_v30, %v1787_v30  ;;  %vm2277_vm6 = vmpackc.low %vm49_vm4, %vm45_vm3  ;;  %v2281_v38 = vsub.f32 %v1785_v32, %v1785_v32  ;;  %v2283_v39 = vsub.f32 %v1789_v33, %v1789_v33 }
   0xc   :  { %2010 = vmatprep.subr.msk.bf16.mxu1 %vm2277_vm6, %v3016_v34  ;;  %vm42_vm7 = vcmp.eq.s32.totalorder %v18_v6, %v2249_v25  ;;  %vm46_vm8 = vcmp.eq.s32.totalorder %v19_v14, %v2249_v25  ;;  %vm44_vm9 = vcmp.eq.s32.totalorder %v18_v6, %v2252_v26  ;;  %vm48_vm10 = vcmp.eq.s32.totalorder %v19_v14, %v2252_v26 }
   0xd   :  { %v1782_v40 = vsel %vm42_vm7, 1.0, %v3024_v2  ;;  %v1786_v41 = vsel %vm46_vm8, 1.0, %v3024_v2  ;;  %vm2294_vm11 = vmpackc.low %vm46_vm8, %vm42_vm7  ;;  %v1784_v43 = vsel %vm44_vm9, 1.0, %v3024_v2  ;;  %v1788_v44 = vsel %vm48_vm10, 1.0, %v3024_v2 }
   0xe   :  { %1916 = vmatpush1.bf16.msk.msra.mxu0 %vm2294_vm11, %v3016_v34  ;;  %v2303_v45 = vsub.f32 %v1782_v40, %v1782_v40  ;;  %v2305_v46 = vsub.f32 %v1786_v41, %v1786_v41  ;;  %vm2307_vm12 = vmpackc.low %vm48_vm10, %vm44_vm9  ;;  %v2311_v48 = vsub.f32 %v1784_v43, %v1784_v43  ;;  %v2313_v49 = vsub.f32 %v1788_v44, %v1788_v44 }
   0xf   :  { %v3083_v47 = vsel %vm2307_vm12, 4294967295, %v3082_v47  ;;  %2012 = vmatpush1.bf16.msk.msra.mxu1 %vm2307_vm12, %v3016_v34  ;;  %vm51_vm13 = vcmp.eq.s32.totalorder %v2234_v19, %v2239_v21  ;;  %vm55_vm14 = vcmp.eq.s32.totalorder %v2236_v20, %v2239_v21  ;;  %vm53_vm15 = vcmp.eq.s32.totalorder %v2234_v19, %v2242_v22 }
  0x10   :  { %3084 = vst [vmem:[#allocation7_spill] sm:$0xff] %v3083_v47  ;;  %vm57_vm0 = vcmp.eq.s32.totalorder %v2236_v20, %v2242_v22  ;;  %v3005_v50 = vand.u32 4294901760, %v2303_v45  ;;  %v3004_v51 = vand.u32 4294901760, %v2305_v46  ;;  %v3003_v52 = vand.u32 4294901760, %v2311_v48  ;;  %vm2330_vm1 = vmpackc.low %vm55_vm14, %vm51_vm13 }
  0x11   :  { %v3002_v53 = vand.u32 4294901760, %v2313_v49  ;;  %v3086_v54 = vsel %vm2330_vm1, 4294967295, %v3085_v54  ;;  %v1791_v55 = vsel %vm51_vm13, 1.0, %v3024_v2  ;;  %v1795_v56 = vsel %vm55_vm14, 1.0, %v3024_v2  ;;  %1918 = vmatprep.subr.msk.bf16.mxu0 %vm2330_vm1, %v3016_v34  ;;  %vm2341_vm2 = vmpackc.low %vm57_vm0, %vm53_vm15 }
  0x12   :  { %3087 = vst [vmem:[#allocation8_spill] sm:$0xff] %v3086_v54  ;;  %v1793_v57 = vsel %vm53_vm15, 1.0, %v3024_v2  ;;  %v1797_v58 = vsel %vm57_vm0, 1.0, %v3024_v2  ;;  %v3089_v59 = vsel %vm2341_vm2, 4294967295, %v3088_v59  ;;  %v2348_v60 = vsub.f32 %v2303_v45, %v3005_v50  ;;  %2014 = vmatprep.subr.msk.bf16.mxu1 %vm2341_vm2, %v3016_v34 }
  0x13   :  { %3090 = vst [vmem:[#allocation9_spill] sm:$0xff] %v3089_v59  ;;  %v2353_v61 = vsub.f32 %v2305_v46, %v3004_v51  ;;  %v2358_v62 = vsub.f32 %v2311_v48, %v3003_v52  ;;  %v2363_v63 = vsub.f32 %v2313_v49, %v3002_v53  ;;  %v2368_v3 = vsub.f32 %v1791_v55, %v1791_v55 }
  0x14   :  { %v2370_v4 = vsub.f32 %v1795_v56, %v1795_v56  ;;  %v2372_v5 = vsub.f32 %v1793_v57, %v1793_v57  ;;  %v2374_v6 = vsub.f32 %v1797_v58, %v1797_v58  ;;  %vm50_vm3 = vcmp.eq.s32.totalorder %v2234_v19, %v2249_v25 }
  0x15   :  { %vm54_vm4 = vcmp.eq.s32.totalorder %v2236_v20, %v2249_v25  ;;  %vm52_vm7 = vcmp.eq.s32.totalorder %v2234_v19, %v2252_v26  ;;  %vm56_vm8 = vcmp.eq.s32.totalorder %v2236_v20, %v2252_v26  ;;  %v1790_v30 = vsel %vm50_vm3, 1.0, %v3024_v2 }
  0x16   :  { %v1794_v32 = vsel %vm54_vm4, 1.0, %v3024_v2  ;;  %vm2390_vm9 = vmpackc.low %vm54_vm4, %vm50_vm3  ;;  %v3091_v33 = vmov 0  ;;  %v1792_v40 = vsel %vm52_vm7, 1.0, %v3024_v2  ;;  %v1796_v41 = vsel %vm56_vm8, 1.0, %v3024_v2 }
  0x17   :  { %v3092_v33 = vsel %vm2390_vm9, 4294967295, %v3091_v33  ;;  %1920 = vmatpush1.bf16.msk.msra.mxu0 %vm2390_vm9, %v3016_v34  ;;  %v2399_v19 = vsub.f32 %v1790_v30, %v1790_v30  ;;  %v2401_v43 = vsub.f32 %v1794_v32, %v1794_v32  ;;  %vm2403_vm10 = vmpackc.low %vm56_vm8, %vm52_vm7  ;;  %v3094_v20 = vmov 0 }
  0x18   :  { %3093 = vst [vmem:[#allocation10_spill] sm:$0xff] %v3092_v33  ;;  %v3095_v20 = vsel %vm2403_vm10, 4294967295, %v3094_v20  ;;  %v2407_v44 = vsub.f32 %v1792_v40, %v1792_v40  ;;  %v2409_v55 = vsub.f32 %v1796_v41, %v1796_v41  ;;  %2016 = vmatpush1.bf16.msk.msra.mxu1 %vm2403_vm10, %v3016_v34  ;;  %vm59_vm13 = vcmp.eq.s32.totalorder %v2244_v23, %v2239_v21 }
  0x19   :  { %3096 = vst [vmem:[#allocation11_spill] sm:$0xff] %v3095_v20  ;;  %vm63_vm14 = vcmp.eq.s32.totalorder %v2246_v24, %v2239_v21  ;;  %vm61_vm15 = vcmp.eq.s32.totalorder %v2244_v23, %v2242_v22  ;;  %vm65_vm0 = vcmp.eq.s32.totalorder %v2246_v24, %v2242_v22  ;;  %v3097_v32 = vmov 0 }
  0x1a   :  { %vm2426_vm3 = vmpackc.low %vm63_vm14, %vm59_vm13  ;;  %v1799_v40 = vsel %vm59_vm13, 1.0, %v3024_v2  ;;  %v1803_v41 = vsel %vm63_vm14, 1.0, %v3024_v2  ;;  %v1801_v0 = vsel %vm61_vm15, 1.0, %v3024_v2  ;;  %v1805_v53 = vsel %vm65_vm0, 1.0, %v3024_v2 }
  0x1b   :  { %v3098_v32 = vsel %vm2426_vm3, 4294967295, %v3097_v32  ;;  %1922 = vmatprep.subr.msk.bf16.mxu0 %vm2426_vm3, %v3016_v34  ;;  %vm2437_vm4 = vmpackc.low %vm65_vm0, %vm61_vm15  ;;  %v3100_v52 = vmov 0  ;;  %v2441_v51 = vsub.f32 %v1799_v40, %v1799_v40  ;;  %v2443_v50 = vsub.f32 %v1803_v41, %v1803_v41 }
  0x1c   :  { %3099 = vst [vmem:[#allocation12_spill] sm:$0xff] %v3098_v32  ;;  %v3101_v52 = vsel %vm2437_vm4, 4294967295, %v3100_v52  ;;  %2018 = vmatprep.subr.msk.bf16.mxu1 %vm2437_vm4, %v3016_v34  ;;  %v2448_v30 = vsub.f32 %v1801_v0, %v1801_v0  ;;  %v2450_v58 = vsub.f32 %v1805_v53, %v1805_v53  ;;  %vm58_vm7 = vcmp.eq.s32.totalorder %v2244_v23, %v2249_v25 }
  0x1d   :  { %3102 = vst [vmem:[#allocation13_spill] sm:$0xff] %v3101_v52  ;;  %vm62_vm8 = vcmp.eq.s32.totalorder %v2246_v24, %v2249_v25  ;;  %vm60_vm13 = vcmp.eq.s32.totalorder %v2244_v23, %v2252_v26  ;;  %vm64_vm14 = vcmp.eq.s32.totalorder %v2246_v24, %v2252_v26  ;;  %v1798_v40 = vsel %vm58_vm7, 1.0, %v3024_v2 }
  0x1e   :  { %v1802_v41 = vsel %vm62_vm8, 1.0, %v3024_v2  ;;  %vm2462_vm15 = vmpackc.low %vm62_vm8, %vm58_vm7  ;;  %v3103_v0 = vmov 0  ;;  %v1800_v53 = vsel %vm60_vm13, 1.0, %v3024_v2  ;;  %v1804_v57 = vsel %vm64_vm14, 1.0, %v3024_v2 }
  0x1f   :  { %v3104_v0 = vsel %vm2462_vm15, 4294967295, %v3103_v0  ;;  %1924 = vmatpush1.bf16.msk.msra.mxu0 %vm2462_vm15, %v3016_v34  ;;  %v2471_v23 = vsub.f32 %v1798_v40, %v1798_v40  ;;  %v2473_v56 = vsub.f32 %v1802_v41, %v1802_v41  ;;  %vm2475_vm0 = vmpackc.low %vm64_vm14, %vm60_vm13  ;;  %v3106_v24 = vmov 0 }
  0x20   :  { %3105 = vst [vmem:[#allocation14_spill] sm:$0xff] %v3104_v0  ;;  %v3107_v24 = vsel %vm2475_vm0, 4294967295, %v3106_v24  ;;  %v2479_v29 = vsub.f32 %v1800_v53, %v1800_v53  ;;  %v2481_v14 = vsub.f32 %v1804_v57, %v1804_v57  ;;  %2020 = vmatpush1.bf16.msk.msra.mxu1 %vm2475_vm0, %v3016_v34  ;;  %vm67_vm7 = vcmp.eq.s32.totalorder %v2254_v27, %v2239_v21 }
  0x21   :  { %3108 = vst [vmem:[#allocation15_spill] sm:$0xff] %v3107_v24  ;;  %vm71_vm8 = vcmp.eq.s32.totalorder %v2256_v28, %v2239_v21  ;;  %vm69_vm13 = vcmp.eq.s32.totalorder %v2254_v27, %v2242_v22  ;;  %vm73_vm14 = vcmp.eq.s32.totalorder %v2256_v28, %v2242_v22  ;;  %v1807_v21 = vsel %vm67_vm7, 1.0, %v3024_v2 }
  0x22   :  { %vm2498_vm0 = vmpackc.low %vm71_vm8, %vm67_vm7  ;;  %v1811_v9 = vsel %vm71_vm8, 1.0, %v3024_v2  ;;  %v1809_v22 = vsel %vm69_vm13, 1.0, %v3024_v2  ;;  %v1813_v57 = vsel %vm73_vm14, 1.0, %v3024_v2  ;;  %v3112_v41 = vmov 0 }
  0x23   :  { %v3110_v13 = vsel %vm2498_vm0, 4294967295, %v3109_v13  ;;  %1926 = vmatprep.subr.msk.bf16.mxu0 %vm2498_vm0, %v3016_v34  ;;  %vm2509_vm15 = vmpackc.low %vm73_vm14, %vm69_vm13  ;;  %v2513_v53 = vsub.f32 %v1807_v21, %v1807_v21  ;;  %v2515_v40 = vsub.f32 %v1811_v9, %v1811_v9  ;;  %v2520_v16 = vsub.f32 %v1809_v22, %v1809_v22 }
  0x24   :  { %3111 = vst [vmem:[#allocation16_spill] sm:$0xff] %v3110_v13  ;;  %v3113_v41 = vsel %vm2509_vm15, 4294967295, %v3112_v41  ;;  %2022 = vmatprep.subr.msk.bf16.mxu1 %vm2509_vm15, %v3016_v34  ;;  %v2522_v15 = vsub.f32 %v1813_v57, %v1813_v57  ;;  %vm66_vm7 = vcmp.eq.s32.totalorder %v2254_v27, %v2249_v25  ;;  %vm70_vm8 = vcmp.eq.s32.totalorder %v2256_v28, %v2249_v25 }
  0x25   :  { %3114 = vst [vmem:[#allocation17_spill] sm:$0xff] %v3113_v41  ;;  %vm68_vm13 = vcmp.eq.s32.totalorder %v2254_v27, %v2252_v26  ;;  %vm72_vm14 = vcmp.eq.s32.totalorder %v2256_v28, %v2252_v26  ;;  %v1806_v9 = vsel %vm66_vm7, 1.0, %v3024_v2  ;;  %v1810_v21 = vsel %vm70_vm8, 1.0, %v3024_v2  ;;  %vm2534_vm15 = vmpackc.low %vm70_vm8, %vm66_vm7 }
  0x26   :  { %v3115_v22 = vmov 0  ;;  %v1808_v57 = vsel %vm68_vm13, 1.0, %v3024_v2  ;;  %v1812_v34 = vsel %vm72_vm14, 1.0, %v3024_v2  ;;  %1928 = vmatpush1.bf16.msk.msra.mxu0 %vm2534_vm15, %v3118_v18  ;;  %v2543_v25 = vsub.f32 %v1806_v9, %v1806_v9  ;;  %vm2547_vm0 = vmpackc.low %vm72_vm14, %vm68_vm13 }
  0x27   :  { %v3116_v22 = vsel %vm2534_vm15, 4294967295, %v3115_v22  ;;  %v2545_v27 = vsub.f32 %v1810_v21, %v1810_v21  ;;  %v3119_v26 = vmov 0  ;;  %v2551_v28 = vsub.f32 %v1808_v57, %v1808_v57  ;;  %2024 = vmatpush1.bf16.msk.msra.mxu1 %vm2547_vm0, %v3118_v18 }
  0x28   :  { %3117 = vst [vmem:[#allocation18_spill] sm:$0xff] %v3116_v22  ;;  %v3120_v26 = vsel %vm2547_vm0, 4294967295, %v3119_v26  ;;  %v2553_v17 = vsub.f32 %v1812_v34, %v1812_v34  ;;  %v3035_v2 = vand.u32 4294901760, %v2273_v35  ;;  %v3040_v1 = vand.u32 4294901760, %v2275_v36 }
  0x29   :  { %3121 = vst [vmem:[#allocation19_spill] sm:$0xff] %v3120_v26  ;;  %v3043_v9 = vand.u32 4294901760, %v2281_v38  ;;  %v3122_v22 = vand.u32 4294901760, %v2283_v39  ;;  %v2580_v57 = vsub.f32 %v2211_v7, %v2219_v10  ;;  %v3123_v34 = vand.u32 4294901760, %v2348_v60 }
  0x2a   :  { %v268_v26 = vsub.f32 %v2273_v35, %v3035_v2  ;;  %v280_v13 = vsub.f32 %v2275_v36, %v3040_v1  ;;  %v3124_v2 = vand.u32 4294901760, %v2353_v61  ;;  %v3125_v0 = vand.u32 4294901760, %v2358_v62 }
  0x2b   :  { %v1013_v21 = vsub.f32 %v2281_v38, %v3043_v9  ;;  %v1025_v41 = vsub.f32 %v2283_v39, %v3122_v22  ;;  %v3126_v1 = vand.u32 4294901760, %v2363_v63  ;;  %v3053_v9 = vand.u32 4294901760, %v2368_v3 }
  0x2c   :  { %v1931_v24 = vpack.c.bf16 %v3124_v2, %v3123_v34  ;;  %v269_v32 = vand.u32 4294901760, %v268_v26  ;;  %v281_v20 = vand.u32 4294901760, %v280_v13  ;;  %v2592_v59 = vand.u32 4294901760, %v2580_v57 }
  0x2d   :  { %v2027_v52 = vpack.c.bf16 %v3126_v1, %v3125_v0  ;;  %v1014_v33 = vand.u32 4294901760, %v1013_v21  ;;  %v1026_v22 = vand.u32 4294901760, %v1025_v41  ;;  %v292_v7 = vsub.f32 %v2368_v3, %v3053_v9 }
  0x2e   :  { %3127 = vst [vmem:[#allocation20_spill] sm:$0xff] %v2592_v59  ;;  %v3052_v2 = vand.u32 4294901760, %v2370_v4  ;;  %v3054_v60 = vand.u32 4294901760, %v2372_v5  ;;  %v1929_v61 = vpack.c.bf16 %v281_v20, %v269_v32  ;;  %v3059_v1 = vand.u32 4294901760, %v2374_v6 }
  0x2f   :  { %v2025_v62 = vpack.c.bf16 %v1026_v22, %v1014_v33  ;;  %v3128_v63 = vand.u32 4294901760, %v2399_v19  ;;  %v235_v0 = vsub.f32 %v2580_v57, %v2592_v59  ;;  %v293_v41 = vand.u32 4294901760, %v292_v7 }
  0x30   :  { %v304_v26 = vsub.f32 %v2370_v4, %v3052_v2  ;;  %v1037_v21 = vsub.f32 %v2372_v5, %v3054_v60  ;;  %1930 = vmatprep.subr.bf16.mxu0 %v1929_v61  ;;  %v1049_v33 = vsub.f32 %v2374_v6, %v3059_v1  ;;  %v3129_v32 = vand.u32 4294901760, %v2401_v43 }
  0x31   :  { %v298_v13 = vsub.f32 %v2399_v19, %v3128_v63  ;;  %2026 = vmatprep.subr.bf16.mxu1 %v2025_v62  ;;  %v3130_v22 = vand.u32 4294901760, %v2407_v44  ;;  %v236_v63 = vand.u32 4294901760, %v235_v0  ;;  %v3131_v60 = vand.u32 4294901760, %v2409_v55 }
  0x32   :  { %v310_v34 = vsub.f32 %v2401_v43, %v3129_v32  ;;  %v305_v2 = vand.u32 4294901760, %v304_v26  ;;  %v1038_v9 = vand.u32 4294901760, %v1037_v21  ;;  %v1050_v62 = vand.u32 4294901760, %v1049_v33 }
  0x33   :  { %v299_v20 = vand.u32 4294901760, %v298_v13  ;;  %v1043_v7 = vsub.f32 %v2407_v44, %v3130_v22  ;;  %v1055_v61 = vsub.f32 %v2409_v55, %v3131_v60  ;;  %v3065_v13 = vand.u32 4294901760, %v2441_v51  ;;  %237 = vmatmul.mubr.f32.vlgmr.msra.gmra.mrb[0].mxu0 %v236_v63  ;;  %982 = vmatmul.mubr.f32.vlgmr.msra.gmra.mrb[0].mxu1 %v236_v63 }
  0x34   :  { %v311_v59 = vand.u32 4294901760, %v310_v34  ;;  %v1933_v1 = vpack.c.bf16 %v305_v2, %v293_v41  ;;  %v3064_v47 = vand.u32 4294901760, %v2443_v50  ;;  %v3063_v22 = vand.u32 4294901760, %v2448_v30  ;;  %1932 = vmatpush1.bf16.msra.mxu0 %v1931_v24  ;;  %2028 = vmatpush1.bf16.msra.mxu1 %v2027_v52 }
  0x35   :  { %v1044_v54 = vand.u32 4294901760, %v1043_v7  ;;  %v1056_v32 = vand.u32 4294901760, %v1055_v61  ;;  %v2029_v0 = vpack.c.bf16 %v1050_v62, %v1038_v9  ;;  %v316_v60 = vsub.f32 %v2441_v51, %v3065_v13 }
  0x36   :  { %v1935_v26 = vpack.c.bf16 %v311_v59, %v299_v20  ;;  %v3062_v21 = vand.u32 4294901760, %v2450_v58  ;;  %1934 = vmatprep.subr.bf16.mxu0 %v1933_v1  ;;  %v3132_v34 = vmov 0.0   ;;  %v328_v2 = vsub.f32 %v2443_v50, %v3064_v47 }
  0x37   :  { %v2031_v33 = vpack.c.bf16 %v1056_v32, %v1044_v54  ;;  %242 = vmatprep.mubr.f32.mxu0 %v3132_v34  ;;  %v1061_v52 = vsub.f32 %v2448_v30, %v3063_v22  ;;  %v3069_v59 = vand.u32 4294901760, %v2513_v53  ;;  %2030 = vmatprep.subr.bf16.mxu1 %v2029_v0  ;;  %v317_v24 = vand.u32 4294901760, %v316_v60 }
  0x38   :  { %987 = vmatprep.mubr.f32.mxu1 %v3132_v34  ;;  %v1073_v54 = vsub.f32 %v2450_v58, %v3062_v21  ;;  %v2644_v9 = vsub.f32 %v2213_v8, %v2222_v11  ;;  %v3133_v1 = vand.u32 4294901760, %v2471_v23  ;;  %v329_v20 = vand.u32 4294901760, %v328_v2  ;;  %1936 = vmatpush1.bf16.msra.mxu0 %v1935_v26 }
  0x39   :  { %v1062_v7 = vand.u32 4294901760, %v1061_v52  ;;  %v3134_v63 = vand.u32 4294901760, %v2473_v56  ;;  %v3135_v62 = vand.u32 4294901760, %v2479_v29  ;;  %2032 = vmatpush1.bf16.msra.mxu1 %v2031_v33  ;;  %v3136_v21 = vand.u32 4294901760, %v2481_v14 }
  0x3a   :  { %v322_v41 = vsub.f32 %v2471_v23, %v3133_v1  ;;  %v1074_v0 = vand.u32 4294901760, %v1073_v54  ;;  %v2656_v8 = vand.u32 4294901760, %v2644_v9  ;;  %v1937_v52 = vpack.c.bf16 %v329_v20, %v317_v24 }
  0x3b   :  { %v334_v61 = vsub.f32 %v2473_v56, %v3134_v63  ;;  %v1067_v32 = vsub.f32 %v2479_v29, %v3135_v62  ;;  %v1079_v2 = vsub.f32 %v2481_v14, %v3136_v21  ;;  %v340_v63 = vsub.f32 %v2513_v53, %v3069_v59 }
  0x3c   :  { %v323_v60 = vand.u32 4294901760, %v322_v41  ;;  %v2033_v47 = vpack.c.bf16 %v1074_v0, %v1062_v7  ;;  %v246_v26 = vsub.f32 %v2644_v9, %v2656_v8  ;;  %v3068_v54 = vand.u32 4294901760, %v2515_v40  ;;  %1938 = vmatprep.subr.bf16.mxu0 %v1937_v52 }
  0x3d   :  { %v335_v1 = vand.u32 4294901760, %v334_v61  ;;  %v1068_v22 = vand.u32 4294901760, %v1067_v32  ;;  %v1080_v33 = vand.u32 4294901760, %v1079_v2  ;;  %v341_v62 = vand.u32 4294901760, %v340_v63 }
  0x3e   :  { %v3067_v13 = vand.u32 4294901760, %v2520_v16  ;;  %v3066_v21 = vand.u32 4294901760, %v2522_v15  ;;  %2034 = vmatprep.subr.bf16.mxu1 %v2033_v47  ;;  %v247_v24 = vand.u32 4294901760, %v246_v26  ;;  %v352_v7 = vsub.f32 %v2515_v40, %v3068_v54 }
  0x3f   :  { %v1939_v41 = vpack.c.bf16 %v335_v1, %v323_v60  ;;  %v2035_v20 = vpack.c.bf16 %v1080_v33, %v1068_v22  ;;  %v2673_v61 = vand.u32 4294901760, %v2224_v12  ;;  %v3137_v47 = vand.u32 4294901760, %v2543_v25 }
  0x40   :  { %v1085_v32 = vsub.f32 %v2520_v16, %v3067_v13  ;;  %v1097_v0 = vsub.f32 %v2522_v15, %v3066_v21  ;;  %v3138_v60 = vand.u32 4294901760, %v2545_v27  ;;  %248 = vmatmul.mubr.f32.gmra.mrb[2].mxu0 %v247_v24  ;;  %993 = vmatmul.mubr.f32.gmra.mrb[2].mxu1 %v247_v24  ;;  %v353_v52 = vand.u32 4294901760, %v352_v7 }
  0x41   :  { %1940 = vmatpush1.bf16.msra.mxu0 %v1939_v41  ;;  %v346_v22 = vsub.f32 %v2543_v25, %v3137_v47  ;;  %v2689_v1 = vsub.f32 %v2224_v12, %v2673_v61  ;;  %v3139_v63 = vand.u32 4294901760, %v2551_v28  ;;  %v3140_v33 = vand.u32 4294901760, %v2553_v17  ;;  %2036 = vmatpush1.bf16.msra.mxu1 %v2035_v20 }
  0x42   :  { %v358_v2 = vsub.f32 %v2545_v27, %v3138_v60  ;;  %253 = vmatprep.mubr.f32.mxu0 %v3132_v34  ;;  %v1086_v47 = vand.u32 4294901760, %v1085_v32  ;;  %v1098_v60 = vand.u32 4294901760, %v1097_v0  ;;  %v1941_v7 = vpack.c.bf16 %v353_v52, %v341_v62  ;;  %998 = vmatprep.mubr.f32.mxu1 %v3132_v34 }
  0x43   :  { %v1091_v26 = vsub.f32 %v2551_v28, %v3139_v63  ;;  %v1103_v41 = vsub.f32 %v2553_v17, %v3140_v33  ;;  %v347_v21 = vand.u32 4294901760, %v346_v22  ;;  %v2700_v12 = vand.u32 4294901760, %v2689_v1 }
  0x44   :  { %v359_v24 = vand.u32 4294901760, %v358_v2  ;;  %v2037_v63 = vpack.c.bf16 %v1098_v60, %v1086_v47  ;;  %v1945_v33 = vpack.c.bf16 %v2275_v36, %v2273_v35  ;;  %v2041_v20 = vpack.c.bf16 %v2283_v39, %v2281_v38  ;;  %1942 = vmatprep.subr.bf16.mxu0 %v1941_v7 }
  0x45   :  { %v1092_v13 = vand.u32 4294901760, %v1091_v26  ;;  %v1104_v54 = vand.u32 4294901760, %v1103_v41  ;;  %v257_v32 = vsub.f32 %v2689_v1, %v2700_v12  ;;  %v1947_v22 = vpack.c.bf16 %v2305_v46, %v2303_v45 }
  0x46   :  { %v1943_v59 = vpack.c.bf16 %v359_v24, %v347_v21  ;;  %2038 = vmatprep.subr.bf16.mxu1 %v2037_v63  ;;  %v1730_v21 = vld [vmem:[%s2999_s2] sm:$0x7]  ;;  %v3070_v2 = vmov 0   ;;  %v1951_v52 = vpack.c.bf16 %v2401_v43, %v2399_v19  ;;  %v2047_v26 = vpack.c.bf16 %v2409_v55, %v2407_v44 }
  0x47   :  { %v2039_v62 = vpack.c.bf16 %v1104_v54, %v1092_v13  ;;  %v258_v0 = vand.u32 4294901760, %v257_v32  ;;  %v2043_v13 = vpack.c.bf16 %v2313_v49, %v2311_v48  ;;  %v2045_v54 = vpack.c.bf16 %v2374_v6, %v2372_v5  ;;  %2171 = vset.pattern.permute.xlu0 %v3070_v2 }
  0x48   :  { %1944 = vmatpush1.bf16.msra.mxu0 %v1943_v59  ;;  %v1949_v59 = vpack.c.bf16 %v2370_v4, %v2368_v3  ;;  %1754 = vperm.xlu0 %2171, %v1730_v21   ;;  %v1953_v41 = vpack.c.bf16 %v2443_v50, %v2441_v51  ;;  %v2049_v47 = vpack.c.bf16 %v2450_v58, %v2448_v30  ;;  %v3169_v2 = vand.u32 4294901760, %v2374_v6  ;;  %v1911_v21 = vld [vmem:[%s2997_s0 + $0x2] ss:$4 sm:$0xf] }
  0x49   :  { %2040 = vmatpush1.bf16.msra.mxu1 %v2039_v62  ;;  %1946 = vmatprep.subr.bf16.mxu0 %v1945_v33  ;;  %v1955_v60 = vpack.c.bf16 %v2473_v56, %v2471_v23  ;;  %v2051_v24 = vpack.c.bf16 %v2481_v14, %v2479_v29  ;;  %v1957_v7 = vpack.c.bf16 %v2515_v40, %v2513_v53  ;;  %v3176_v6 = vand.u32 4294901760, %v2443_v50 }
  0x4a   :  { %2042 = vmatprep.subr.bf16.mxu1 %v2041_v20  ;;  %259 = vmatmul.mubr.f32.gmra.mrb[4].mxu0 %v258_v0  ;;  %v2053_v63 = vpack.c.bf16 %v2522_v15, %v2520_v16  ;;  %v1959_v33 = vpack.c.bf16 %v2545_v27, %v2543_v25  ;;  %v2055_v20 = vpack.c.bf16 %v2553_v17, %v2551_v28  ;;  %v3180_v50 = vand.u32 4294901760, %v2473_v56 }
  0x4b   :  { %1004 = vmatmul.mubr.f32.gmra.mrb[4].mxu1 %v258_v0  ;;  %409 = vmatprep.mubr.f32.mxu0 %v3132_v34  ;;  %v3194_v42 = vmov 0  }
  0x4c   :  { %1154 = vmatprep.mubr.f32.mxu1 %v3132_v34 }
  0x4e   :  { %411 = vmatmul.mubr.f32.vlgmr.msra.gmra.mrb[0].mxu0 %v2219_v10 }
  0x4f   :  { %1156 = vmatmul.mubr.f32.vlgmr.msra.gmra.mrb[0].mxu1 %v2219_v10  ;;  %1948 = vmatpush1.bf16.msra.mxu0 %v1947_v22  ;;  %v3197_v22 = vld [vmem:[#allocation3_spill] sm:$0xff] }
  0x50   :  { %2044 = vmatpush1.bf16.msra.mxu1 %v2043_v13  ;;  %1950 = vmatprep.subr.bf16.mxu0 %v1949_v59  ;;  %v3150_v59 = vld [vmem:[#allocation15_spill] sm:$0xff] }
  0x51   :  { %2046 = vmatprep.subr.bf16.mxu1 %v2045_v54  ;;  %416 = vmatprep.mubr.f32.mxu0 %v3132_v34  ;;  %vm3151_vm8 = vnez %v3150_v59  ;;  %v3152_v54 = vld [vmem:[#allocation16_spill] sm:$0xff] }
  0x52   :  { %1161 = vmatprep.mubr.f32.mxu1 %v3132_v34  ;;  %418 = vmatmul.mubr.f32.gmra.mrb[2].mxu0 %v2222_v11  ;;  %vm3153_vm13 = vnez %v3152_v54  ;;  %v1677_v54 = vrot.slane %v1910_v37, %v3197_v22 }
  0x53   :  { %1163 = vmatmul.mubr.f32.gmra.mrb[2].mxu1 %v2222_v11  ;;  %1952 = vmatpush1.bf16.msra.mxu0 %v1951_v52  ;;  %v3154_v52 = vld [vmem:[#allocation17_spill] sm:$0xff] }
  0x54   :  { %2048 = vmatpush1.bf16.msra.mxu1 %v2047_v26  ;;  %1954 = vmatprep.subr.bf16.mxu0 %v1953_v41  ;;  %vm3155_vm14 = vnez %v3154_v52  ;;  %v3156_v26 = vand.u32 4294901760, %v2273_v35  ;;  %v3162_v35 = vand.u32 4294901760, %v2303_v45 }
  0x55   :  { %2050 = vmatprep.subr.bf16.mxu1 %v2049_v47  ;;  %423 = vmatprep.mubr.f32.mxu0 %v3132_v34  ;;  %v3158_v47 = vand.u32 4294901760, %v2281_v38 }
  0x56   :  { %1168 = vmatprep.mubr.f32.mxu1 %v3132_v34  ;;  %425 = vmatmul.mubr.f32.gmra.mrb[4].mxu0 %v2673_v61 }
  0x57   :  { %1170 = vmatmul.mubr.f32.gmra.mrb[4].mxu1 %v2673_v61  ;;  %1956 = vmatpush1.bf16.msra.mxu0 %v1955_v60  ;;  %v3159_v60 = vand.u32 4294901760, %v2283_v39  ;;  %v3164_v39 = vand.u32 4294901760, %v2311_v48  ;;  %v3172_v48 = vand.u32 4294901760, %v2401_v43 }
  0x58   :  { %2052 = vmatpush1.bf16.msra.mxu1 %v2051_v24  ;;  %1958 = vmatprep.subr.bf16.mxu0 %v1957_v7 }
  0x59   :  { %2054 = vmatprep.subr.bf16.mxu1 %v2053_v63  ;;  %527 = vmatprep.mubr.f32.mxu0 %v3132_v34  ;;  %v2073_v24 = vpack.c.bf16 %v3159_v60, %v3158_v47  ;;  %v3168_v60 = vand.u32 4294901760, %v2372_v5  ;;  %v3170_v63 = vld [vmem:[#allocation20_spill] sm:$0xff]  ;;  %v3175_v5 = vand.u32 4294901760, %v2441_v51  ;;  %v3179_v51 = vand.u32 4294901760, %v2471_v23 }
  0x5a   :  { %1272 = vmatprep.mubr.f32.mxu1 %v3132_v34 }
  0x5b   :  { %1960 = vmatpush1.bf16.msra.mxu0 %v1959_v33  ;;  %v3165_v33 = vand.u32 4294901760, %v2313_v49  ;;  %v2077_v45 = vpack.c.bf16 %v3169_v2, %v3168_v60  ;;  %v1985_v2 = vpack.c.bf16 %v3176_v6, %v3175_v5  ;;  %v1987_v43 = vpack.c.bf16 %v3180_v50, %v3179_v51 }
  0x5c   :  { %2056 = vmatpush1.bf16.msra.mxu1 %v2055_v20  ;;  %1962 = vmatprep.subr.msk.bf16.mxu0 %vm2264_vm5, %v3118_v18 }
  0x5d   :  { %2058 = vmatprep.subr.msk.bf16.mxu1 %vm2277_vm6, %v3118_v18  ;;  %v2075_v20 = vpack.c.bf16 %v3165_v33, %v3164_v39 }
  0x5e   :  { %530 = vmatmul.mubr.f32.vlgmr.msra.gmra.mrb[0].mxu0 %v2580_v57 }
  0x5f   :  { %1275 = vmatmul.mubr.f32.vlgmr.msra.gmra.mrb[0].mxu1 %v2580_v57  ;;  %1964 = vmatpush1.bf16.msk.msra.mxu0 %vm2294_vm11, %v3118_v18 }
  0x60   :  { %2060 = vmatpush1.bf16.msk.msra.mxu1 %vm2307_vm12, %v3118_v18  ;;  %1966 = vmatprep.subr.msk.bf16.mxu0 %vm2330_vm1, %v3118_v18 }
  0x61   :  { %2062 = vmatprep.subr.msk.bf16.mxu1 %vm2341_vm2, %v3118_v18  ;;  %535 = vmatprep.mubr.f32.mxu0 %v3132_v34 }
  0x62   :  { %1280 = vmatprep.mubr.f32.mxu1 %v3132_v34  ;;  %538 = vmatmul.mubr.f32.gmra.mrb[2].mxu0 %v2644_v9 }
  0x63   :  { %1283 = vmatmul.mubr.f32.gmra.mrb[2].mxu1 %v2644_v9  ;;  %1968 = vmatpush1.bf16.msk.msra.mxu0 %vm2390_vm9, %v3118_v18  ;;  %v3148_v9 = vld [vmem:[#allocation14_spill] sm:$0xff] }
  0x64   :  { %2064 = vmatpush1.bf16.msk.msra.mxu1 %vm2403_vm10, %v3118_v18  ;;  %1970 = vmatprep.subr.msk.bf16.mxu0 %vm2426_vm3, %v3118_v18  ;;  %vm3149_vm7 = vnez %v3148_v9  ;;  %v3198_v9 = vld [vmem:[#allocation4_spill] sm:$0xff] }
  0x65   :  { %2066 = vmatprep.subr.msk.bf16.mxu1 %vm2437_vm4, %v3118_v18  ;;  %543 = vmatprep.mubr.f32.mxu0 %v3132_v34  ;;  %v1685_v52 = vrot.slane %v1910_v37, %v3198_v9  ;;  %v1716_v60 = vrot.slane %v1911_v21, %v3198_v9 }
  0x66   :  { %1288 = vmatprep.mubr.f32.mxu1 %v3132_v34  ;;  %546 = vmatmul.mubr.f32.gmra.mrb[4].mxu0 %v2689_v1 }
  0x67   :  { %1291 = vmatmul.mubr.f32.gmra.mrb[4].mxu1 %v2689_v1  ;;  %1972 = vmatpush1.bf16.msk.msra.mxu0 %vm3149_vm7, %v3118_v18  ;;  %v3157_v1 = vand.u32 4294901760, %v2275_v36  ;;  %v3163_v36 = vand.u32 4294901760, %v2305_v46  ;;  %v3171_v46 = vand.u32 4294901760, %v2399_v19 }
  0x68   :  { %2068 = vmatpush1.bf16.msk.msra.mxu1 %vm3151_vm8, %v3118_v18  ;;  %1974 = vmatprep.subr.msk.bf16.mxu0 %vm3153_vm13, %v3118_v18 }
  0x69   :  { %2070 = vmatprep.subr.msk.bf16.mxu1 %vm3155_vm14, %v3118_v18  ;;  %v1977_v41 = vpack.c.bf16 %v3157_v1, %v3156_v26  ;;  %632 = vmatprep.mubr.f32.mxu0 %v3132_v34  ;;  %v1979_v38 = vpack.c.bf16 %v3163_v36, %v3162_v35  ;;  %v3166_v26 = vand.u32 4294901760, %v2368_v3  ;;  %v3167_v1 = vand.u32 4294901760, %v2370_v4 }
  0x6a   :  { %1377 = vmatprep.mubr.f32.mxu1 %v3132_v34  ;;  %v1983_v49 = vpack.c.bf16 %v3172_v48, %v3171_v46  ;;  %v3173_v3 = vand.u32 4294901760, %v2407_v44  ;;  %v3174_v4 = vand.u32 4294901760, %v2409_v55  ;;  %v3181_v44 = vand.u32 4294901760, %v2479_v29 }
  0x6b   :  { %1976 = vmatpush1.bf16.msk.msra.mxu0 %vm2534_vm15, %v3118_v18  ;;  %v1981_v47 = vpack.c.bf16 %v3167_v1, %v3166_v26  ;;  %v3182_v55 = vand.u32 4294901760, %v2481_v14  ;;  %v3184_v35 = vand.u32 4294901760, %v2515_v40  ;;  %v3187_v14 = vand.u32 4294901760, %v2543_v25 }
  0x6c   :  { %2072 = vmatpush1.bf16.msk.msra.mxu1 %vm2547_vm0, %v3118_v18  ;;  %1978 = vmatprep.subr.bf16.mxu0 %v1977_v41  ;;  %v2079_v41 = vpack.c.bf16 %v3174_v4, %v3173_v3  ;;  %v3188_v29 = vand.u32 4294901760, %v2545_v27 }
  0x6d   :  { %2074 = vmatprep.subr.bf16.mxu1 %v2073_v24  ;;  %v3177_v24 = vand.u32 4294901760, %v2448_v30  ;;  %v3183_v30 = vand.u32 4294901760, %v2513_v53 }
  0x6e   :  { %636 = vmatmul.mubr.f32.vlgmr.msra.gmra.mrb[0].mxu0 %v3170_v63  ;;  %v1991_v56 = vpack.c.bf16 %v3188_v29, %v3187_v14 }
  0x6f   :  { %1381 = vmatmul.mubr.f32.vlgmr.msra.gmra.mrb[0].mxu1 %v3170_v63  ;;  %1980 = vmatpush1.bf16.msra.mxu0 %v1979_v38  ;;  %v3178_v63 = vand.u32 4294901760, %v2450_v58  ;;  %v2083_v58 = vpack.c.bf16 %v3182_v55, %v3181_v44  ;;  %v1989_v36 = vpack.c.bf16 %v3184_v35, %v3183_v30  ;;  %v3186_v38 = vand.u32 4294901760, %v2522_v15 }
  0x70   :  { %2076 = vmatpush1.bf16.msra.mxu1 %v2075_v20  ;;  %1982 = vmatprep.subr.bf16.mxu0 %v1981_v47  ;;  %v3190_v15 = vand.u32 4294901760, %v2553_v17  ;;  %v1708_v47 = vrot.slane %v1911_v21, %v3197_v22 }
  0x71   :  { %2078 = vmatprep.subr.bf16.mxu1 %v2077_v45  ;;  %v2081_v19 = vpack.c.bf16 %v3178_v63, %v3177_v24  ;;  %641 = vmatprep.mubr.f32.mxu0 %v3132_v34 }
  0x72   :  { %1386 = vmatprep.mubr.f32.mxu1 %v3132_v34  ;;  %645 = vmatmul.mubr.f32.gmra.mrb[2].mxu0 %v2656_v8 }
  0x73   :  { %1390 = vmatmul.mubr.f32.gmra.mrb[2].mxu1 %v2656_v8  ;;  %1984 = vmatpush1.bf16.msra.mxu0 %v1983_v49  ;;  %v3185_v8 = vand.u32 4294901760, %v2520_v16  ;;  %v3189_v16 = vand.u32 4294901760, %v2551_v28  ;;  %v3195_v28 = vld [vmem:[#allocation5_spill] sm:$0xff] }
  0x74   :  { %2080 = vmatpush1.bf16.msra.mxu1 %v2079_v41  ;;  %1986 = vmatprep.subr.bf16.mxu0 %v1985_v2  ;;  %v1673_v0 = vrot.slane %v1910_v37, %v3195_v28  ;;  %v1704_v26 = vrot.slane %v1911_v21, %v3195_v28 }
  0x75   :  { %2082 = vmatprep.subr.bf16.mxu1 %v2081_v19  ;;  %v2085_v23 = vpack.c.bf16 %v3186_v38, %v3185_v8  ;;  %650 = vmatprep.mubr.f32.mxu0 %v3132_v34  ;;  %v2087_v40 = vpack.c.bf16 %v3190_v15, %v3189_v16 }
  0x76   :  { %1395 = vmatprep.mubr.f32.mxu1 %v3132_v34  ;;  %654 = vmatmul.mubr.f32.gmra.mrb[4].mxu0 %v2700_v12 }
  0x77   :  { %1399 = vmatmul.mubr.f32.gmra.mrb[4].mxu1 %v2700_v12  ;;  %1988 = vmatpush1.bf16.msra.mxu0 %v1987_v43 }
  0x78   :  { %2084 = vmatpush1.bf16.msra.mxu1 %v2083_v58  ;;  %1990 = vmatprep.subr.bf16.mxu0 %v1989_v36 }
  0x79   :  { %2086 = vmatprep.subr.bf16.mxu1 %v2085_v23  ;;  %772 = vmatprep.mubr.f32.mxu0 %v3132_v34 }
  0x7a   :  { %1517 = vmatprep.mubr.f32.mxu1 %v3132_v34 }
  0x7b   :  { %1992 = vmatpush1.bf16.msra.mxu0 %v1991_v56 }
  0x7c   :  { %2088 = vmatpush1.bf16.msra.mxu1 %v2087_v40  ;;  %1994 = vmatprep.subr.msk.bf16.mxu0 %vm2264_vm5, %v3118_v18 }
  0x7d   :  { %2090 = vmatprep.subr.msk.bf16.mxu1 %vm2277_vm6, %v3118_v18 }
  0x7e   :  { %774 = vmatmul.mubr.f32.vlgmr.msra.gmra.mrb[0].mxu0 %v2219_v10 }
  0x7f   :  { %1519 = vmatmul.mubr.f32.vlgmr.msra.gmra.mrb[0].mxu1 %v2219_v10  ;;  %1996 = vmatpush1.bf16.msk.msra.mxu0 %vm2294_vm11, %v3118_v18 }
  0x80   :  { %2092 = vmatpush1.bf16.msk.msra.mxu1 %vm2307_vm12, %v3118_v18  ;;  %1998 = vmatprep.subr.msk.bf16.mxu0 %vm2330_vm1, %v3118_v18 }
  0x81   :  { %2094 = vmatprep.subr.msk.bf16.mxu1 %vm2341_vm2, %v3118_v18  ;;  %779 = vmatprep.mubr.f32.mxu0 %v3132_v34 }
  0x82   :  { %1524 = vmatprep.mubr.f32.mxu1 %v3132_v34  ;;  %781 = vmatmul.mubr.f32.gmra.mrb[2].mxu0 %v2222_v11 }
  0x83   :  { %1526 = vmatmul.mubr.f32.gmra.mrb[2].mxu1 %v2222_v11  ;;  %2000 = vmatpush1.bf16.msk.msra.mxu0 %vm2390_vm9, %v3118_v18 }
  0x84   :  { %2096 = vmatpush1.bf16.msk.msra.mxu1 %vm2403_vm10, %v3118_v18  ;;  %2002 = vmatprep.subr.msk.bf16.mxu0 %vm2426_vm3, %v3118_v18 }
  0x85   :  { %2098 = vmatprep.subr.msk.bf16.mxu1 %vm2437_vm4, %v3118_v18  ;;  %786 = vmatprep.mubr.f32.mxu0 %v3132_v34 }
  0x86   :  { %1531 = vmatprep.mubr.f32.mxu1 %v3132_v34  ;;  %788 = vmatmul.mubr.f32.gmra.mrb[4].mxu0 %v2673_v61 }
  0x87   :  { %1533 = vmatmul.mubr.f32.gmra.mrb[4].mxu1 %v2673_v61  ;;  %2004 = vmatpush1.bf16.msk.msra.mxu0 %vm3149_vm7, %v3118_v18 }
  0x88   :  { %2100 = vmatpush1.bf16.msk.msra.mxu1 %vm3151_vm8, %v3118_v18  ;;  %2006 = vmatprep.subr.msk.bf16.mxu0 %vm3153_vm13, %v3118_v18 }
  0x89   :  { %2102 = vmatprep.subr.msk.bf16.mxu1 %vm3155_vm14, %v3118_v18  ;;  %874 = vmatprep.mubr.f32.mxu0 %v3132_v34 }
  0x8a   :  { %1619 = vmatprep.mubr.f32.mxu1 %v3132_v34 }
  0x8b   :  { %2008 = vmatpush1.bf16.msk.msra.mxu0 %vm2534_vm15, %v3118_v18 }
  0x8c   :  { %2104 = vmatpush1.bf16.msk.msra.mxu1 %vm2547_vm0, %v3118_v18  ;;  %v3192_v18 = vlaneseq }
  0x8e   :  { %876 = vmatmul.mubr.f32.vlgmr.msra.gmra.mrb[0].mxu0 %v2219_v10  ;;  %vm1773_vm5 = vcmp.lt.s32.totalorder %v3192_v18, 512 }
  0x8f   :  { %1621 = vmatmul.mubr.f32.vlgmr.msra.gmra.mrb[0].mxu1 %v2219_v10  ;;  %881 = vmatprep.mubr.f32.mxu0 %v3132_v34  ;;  %1912 = vst.msk [vmem:[%s3000_s3 + $0x3] ss:$4 sm:$0xf] %vm1773_vm5, %v2175_v31  ;;  %v3193_v10 = vld [vmem:[#allocation2_spill] sm:$0xff] }
  0x90   :  { %1626 = vmatprep.mubr.f32.mxu1 %v3132_v34  ;;  %vm1729_vm6 = vcmp.lt.f32.partialorder %v3193_v10, 0.0 }
  0x91   :  { %v1731_v53 = vsel %vm1729_vm6, 1, %v3194_v42 }
  0x92   :  { %883 = vmatmul.mubr.f32.gmra.mrb[2].mxu0 %v2222_v11  ;;  %v1735_v7 = vrot.slane %v1731_v53, %v3195_v28  ;;  %v1739_v24 = vrot.slane %v1731_v53, %v3197_v22  ;;  %v1747_v63 = vrot.slane %v1731_v53, %v3198_v9 }
  0x93   :  { %1628 = vmatmul.mubr.f32.gmra.mrb[2].mxu1 %v2222_v11  ;;  %888 = vmatprep.mubr.f32.mxu0 %v3132_v34  ;;  %v1641_v11 = vld [vmem:[%s2997_s0] ss:$4 sm:$0xf] }
  0x94   :  { %1633 = vmatprep.mubr.f32.mxu1 %v3132_v34  ;;  %v1646_v34 = vrot.slane %v1641_v11, %v3195_v28  ;;  %v1650_v13 = vrot.slane %v1641_v11, %v3197_v22  ;;  %v1658_v59 = vrot.slane %v1641_v11, %v3198_v9  ;;  %vm1748_vm11 = vcmp.eq.s32.totalorder %v1735_v7, 1 }
  0x95   :  { %vm1749_vm1 = vcmp.eq.s32.totalorder %v1739_v24, 1  ;;  %vm1751_vm2 = vcmp.eq.s32.totalorder %v1747_v63, 1 }
  0x96   :  { %890 = vmatmul.mubr.f32.gmra.mrb[4].mxu0 %v2673_v61 }
  0x97   :  { %1635 = vmatmul.mubr.f32.gmra.mrb[4].mxu1 %v2673_v61  ;;  %v3196_v61 = vld [vmem:[#allocation6_spill] sm:$0xff] }
  0x98   :  { %v1654_v12 = vrot.slane %v1641_v11, %v3196_v61  ;;  %v1681_v57 = vrot.slane %v1910_v37, %v3196_v61  ;;  %v1743_v39 = vrot.slane %v1731_v53, %v3196_v61  ;;  %v1712_v1 = vrot.slane %v1911_v21, %v3196_v61 }
  0x9a   :  { %vm1750_vm12 = vcmp.eq.s32.totalorder %v1743_v39, 1 }
  0xc7   :  { %v1755_v23 = vpop.permute.xlu0 %1754 }
 0x161   :  { %v877_v25 = vpop.f32.mrb[0].mxu0 }
 0x162   :  { %v1622_v27 = vpop.f32.mrb[0].mxu1  ;;  %v879_v32 = vpop.f32.mrb[1].mxu0  ;;  %v1663_v45 = vmul.f32 %v1646_v34, %v877_v25 }
 0x163   :  { %v1624_v62 = vpop.f32.mrb[1].mxu1  ;;  %v1665_v46 = vmul.f32 %v1654_v12, %v1622_v27  ;;  %v1664_v41 = vmul.f32 %v1650_v13, %v879_v32 }
 0x164   :  { %v1666_v5 = vmul.f32 %v1658_v59, %v1624_v62 }
 0x165   :  { %v884_v33 = vpop.f32.mrb[2].mxu0 }
 0x166   :  { %v1629_v20 = vpop.f32.mrb[2].mxu1  ;;  %v1690_v48 = vmul.f32 %v1673_v0, %v884_v33  ;;  %v886_v3 = vpop.f32.mrb[3].mxu0 }
 0x167   :  { %v1692_v49 = vmul.f32 %v1681_v57, %v1629_v20  ;;  %v1631_v4 = vpop.f32.mrb[3].mxu1  ;;  %v1691_v6 = vmul.f32 %v1677_v54, %v886_v3 }
 0x168   :  { %v1693_v2 = vmul.f32 %v1685_v52, %v1631_v4  ;;  %v1694_v19 = vadd.f32 %v1690_v48, %v1663_v45 }
 0x169   :  { %v1696_v51 = vadd.f32 %v1692_v49, %v1665_v46  ;;  %v1695_v50 = vadd.f32 %v1691_v6, %v1664_v41  ;;  %v891_v44 = vpop.f32.mrb[4].mxu0 }
 0x16a   :  { %v1697_v43 = vadd.f32 %v1693_v2, %v1666_v5  ;;  %v1636_v55 = vpop.f32.mrb[4].mxu1  ;;  %v1721_v58 = vmul.f32 %v1704_v26, %v891_v44  ;;  %v893_v35 = vpop.f32.mrb[5].mxu0 }
 0x16b   :  { %v1723_v30 = vmul.f32 %v1712_v1, %v1636_v55  ;;  %v1638_v36 = vpop.f32.mrb[5].mxu1  ;;  %v1722_v8 = vmul.f32 %v1708_v47, %v893_v35 }
 0x16c   :  { %v1724_v38 = vmul.f32 %v1716_v60, %v1638_v36  ;;  %v1725_v14 = vadd.f32 %v1721_v58, %v1694_v19 }
 0x16d   :  { %v1727_v29 = vadd.f32 %v1723_v30, %v1696_v51  ;;  %v1726_v56 = vadd.f32 %v1722_v8, %v1695_v50 }
 0x16e   :  { %v1728_v16 = vadd.f32 %v1724_v38, %v1697_v43  ;;  %v1757_v15 = vsel %vm1748_vm11, %v1755_v23, %v1725_v14 }
 0x16f   :  { %v1759_v40 = vsel %vm1750_vm12, %v1755_v23, %v1727_v29  ;;  %v1758_v17 = vsel %vm1749_vm1, %v1755_v23, %v1726_v56 }
 0x170   :  { %v1760_v18 = vsel %vm1751_vm2, %v1755_v23, %v1728_v16  ;;  %v1765_v31 = vcombine.low %v1757_v15, %v1758_v17 }
 0x171   :  { %v1766_v10 = vcombine.low %v1759_v40, %v1760_v18 }
 0x172   :  { %1769 = vst [vmem:[%s3000_s3] sm:$0x77] %v1765_v31 }
 0x173   :  { %1770 = vst [vmem:[%s3000_s3 + $0x8] sm:$0x77] %v1766_v10 }

</bundles_post_ra>
